<compile_context>
chip_gen: v7x
topology: tpu7x:2x2x1
jax: 0.10.0
libtpu: 0.0.40
codegen_flags: <defaults>
</compile_context>

<pallas_src>
import jax
import jax.numpy as jnp
from jax.experimental import pallas as pl
from jax.experimental.pallas import tpu as pltpu


# Offsets into the flat parameter vector (row-major [in, out] weights).
_W1, _B1 = 0, 6      # W1: [2,3] -> flat[0:6],  b1: flat[6:9]
_W2, _B2 = 9, 18     # W2: [3,3] -> flat[9:18], b2: flat[18:21]
_W3, _B3 = 21, 27    # W3: [3,2] -> flat[21:27], b3: flat[27:29]

_LANES = 128
_SUBL = 8


def mlp_kernel(p_ref, x_ref, o_ref):
    """p_ref: SMEM flat params [32] f32.
    x_ref: VMEM [2, TR, 128]  (batch dense on sublanes+lanes).
    o_ref: VMEM [2, TR, 128]."""
    x0 = x_ref[0]          # [TR, 128] -- fully packed vregs
    x1 = x_ref[1]

    # fc1 + relu : h1_j = relu(x0*W1[0,j] + x1*W1[1,j] + b1[j])   (pure VPU)
    h1 = [
        jnp.maximum(
            x0 * p_ref[_W1 + 0 * 3 + j]
            + x1 * p_ref[_W1 + 1 * 3 + j]
            + p_ref[_B1 + j],
            0.0,
        )
        for j in range(3)
    ]

    # fc2 + relu
    h2 = [
        jnp.maximum(
            h1[0] * p_ref[_W2 + 0 * 3 + j]
            + h1[1] * p_ref[_W2 + 1 * 3 + j]
            + h1[2] * p_ref[_W2 + 2 * 3 + j]
            + p_ref[_B2 + j],
            0.0,
        )
        for j in range(3)
    ]

    # fc3 (no activation) -- dense stores, one leading-axis slab per output feature.
    for j in range(2):
        o_ref[j, :, :] = (
            h2[0] * p_ref[_W3 + 0 * 2 + j]
            + h2[1] * p_ref[_W3 + 1 * 2 + j]
            + h2[2] * p_ref[_W3 + 2 * 2 + j]
            + p_ref[_B3 + j]
        )


def _flatten_params(params):
    w1, b1, w2, b2, w3, b3 = params
    flat = jnp.concatenate(
        [w1.reshape(-1), b1.reshape(-1), w2.reshape(-1),
         b2.reshape(-1), w3.reshape(-1), b3.reshape(-1)]
    )  # 29 floats
    return jnp.pad(flat, (0, 32 - flat.shape[0]))  # pad to 32 for SMEM tidiness


def mlp_forward(x, params, *, tile_rows=1024):
    """x: [N, 2] float32 -> [N, 2] float32 (fc1->relu->fc2->relu->fc3)."""
    N, D_in = x.shape
    assert D_in == 2
    D_out = 2

    # ---- pack the batch densely onto (sublane, lane) --------------------------
    n_rows = -(-N // _LANES)                       # rows of 128 lanes
    n_rows = -(-n_rows // _SUBL) * _SUBL           # sublane multiple

    eff_rows = min(tile_rows, n_rows)
    # Prefer >= 2 grid steps so v7x's two TensorCores can each take a shard.
    if n_rows // eff_rows < 2 and eff_rows > _SUBL:
        eff_rows = max(_SUBL, (eff_rows // 2 // _SUBL) * _SUBL)
    n_rows = -(-n_rows // eff_rows) * eff_rows     # pad rows to tile multiple
    n_pad = n_rows * _LANES
    grid = (n_rows // eff_rows,)

    # [D, n_rows, 128]: feature on leading axis, batch fills sublanes+lanes.
    xT = jnp.zeros((D_in, n_pad), jnp.float32).at[:, :N].set(x.T)
    x3 = xT.reshape(D_in, n_rows, _LANES)
    p_flat = _flatten_params(params)

    out3 = pl.pallas_call(
        mlp_kernel,
        out_shape=jax.ShapeDtypeStruct((D_out, n_rows, _LANES), jnp.float32),
        grid_spec=pltpu.PrefetchScalarGridSpec(
            num_scalar_prefetch=0,
            grid=grid,
            in_specs=[
                # all ~29 weight/bias scalars in SMEM, resident for the whole call
                pl.BlockSpec(memory_space=pltpu.MemorySpace.SMEM),
                # x tile: full feature dim (2), large dense batch-row tile
                pl.BlockSpec((D_in, eff_rows, _LANES), lambda i: (0, i, 0)),
            ],
            out_specs=pl.BlockSpec((D_out, eff_rows, _LANES), lambda i: (0, i, 0)),
        ),
        compiler_params=pltpu.CompilerParams(
            dimension_semantics=("parallel",)
        ),
    )(p_flat, x3)

    return out3.reshape(D_out, n_pad)[:, :N].T


def init_params(key):
    """Deterministic init matching the PyTorch module's layer shapes.
    PyTorch Linear uses U(-1/sqrt(fan_in), 1/sqrt(fan_in)); reproduced here.
    Weights stored as [in, out] so y = x @ W + b."""
    def linear_init(k, fan_in, fan_out):
        kw, kb = jax.random.split(k)
        bound = 1.0 / jnp.sqrt(jnp.float32(fan_in))
        w = jax.random.uniform(kw, (fan_in, fan_out), jnp.float32, -bound, bound)
        b = jax.random.uniform(kb, (1, fan_out), jnp.float32, -bound, bound)
        return w, b

    k1, k2, k3 = jax.random.split(key, 3)
    w1, b1 = linear_init(k1, 2, 3)   # fc1: Linear(2, 3)
    w2, b2 = linear_init(k2, 3, 3)   # fc2: Linear(3, 3)
    w3, b3 = linear_init(k3, 3, 2)   # fc3: Linear(3, 2)
    return (w1, b1, w2, b2, w3, b3)


def mlp_reference(x, params):
    w1, b1, w2, b2, w3, b3 = params
    h1 = jnp.maximum(x @ w1 + b1, 0.0)
    h2 = jnp.maximum(h1 @ w2 + b2, 0.0)
    return h2 @ w3 + b3


if __name__ == "__main__":
    key = jax.random.PRNGKey(0)
    k_x, k_p = jax.random.split(key)

    N = 1000  # small batch of 2-D points (non-multiple of 128 to exercise padding)
    x = jax.random.normal(k_x, (N, 2), dtype=jnp.float32)
    params = init_params(k_p)

    out = mlp_forward(x, params)
    out = jax.block_until_ready(out)

    ref = mlp_reference(x, params)
    assert out.shape == (N, 2)
    assert jnp.allclose(out, ref, atol=1e-5, rtol=1e-5), "mismatch vs reference"

    print("KERNEL_OK")
</pallas_src>

<mosaic_0001>
module attributes {stable_mosaic.version = 11 : i64} {
  func.func @mlp_kernel(%arg0: i32, %arg1: memref<32xf32, #tpu.memory_space<smem>>, %arg2: memref<2x8x128xf32, #tpu.memory_space<vmem>>, %arg3: memref<2x8x128xf32, #tpu.memory_space<vmem>>) attributes {dimension_semantics = [#tpu.dimension_semantics<parallel>], iteration_bounds = array<i64: 1>, scalar_prefetch = 0 : i64, scratch_operands = 0 : i64, tpu.core_type = #tpu.core_type<tc>, window_params = [{transform_indices = @transform_0, window_bounds = array<i64: 32>}, {transform_indices = @transform_1, window_bounds = array<i64: 2, 8, 128>}, {transform_indices = @transform_2, window_bounds = array<i64: 2, 8, 128>}]} {
    %c0 = arith.constant 0 : index
    %c0_0 = arith.constant 0 : index
    %c0_1 = arith.constant 0 : index
    %0 = vector.load %arg2[%c0, %c0_0, %c0_1] : memref<2x8x128xf32, #tpu.memory_space<vmem>>, vector<1x8x128xf32>
    %1 = vector.shape_cast %0 : vector<1x8x128xf32> to vector<8x128xf32>
    %c1 = arith.constant 1 : index
    %c0_2 = arith.constant 0 : index
    %c0_3 = arith.constant 0 : index
    %2 = vector.load %arg2[%c1, %c0_2, %c0_3] : memref<2x8x128xf32, #tpu.memory_space<vmem>>, vector<1x8x128xf32>
    %3 = vector.shape_cast %2 : vector<1x8x128xf32> to vector<8x128xf32>
    %c0_4 = arith.constant 0 : index
    %4 = memref.load %arg1[%c0_4] : memref<32xf32, #tpu.memory_space<smem>>
    %5 = vector.broadcast %4 : f32 to vector<8x128xf32>
    %6 = arith.mulf %1, %5 : vector<8x128xf32>
    %c3 = arith.constant 3 : index
    %7 = memref.load %arg1[%c3] : memref<32xf32, #tpu.memory_space<smem>>
    %8 = vector.broadcast %7 : f32 to vector<8x128xf32>
    %9 = arith.mulf %3, %8 : vector<8x128xf32>
    %10 = arith.addf %6, %9 : vector<8x128xf32>
    %c6 = arith.constant 6 : index
    %11 = memref.load %arg1[%c6] : memref<32xf32, #tpu.memory_space<smem>>
    %12 = vector.broadcast %11 : f32 to vector<8x128xf32>
    %13 = arith.addf %10, %12 : vector<8x128xf32>
    %cst = arith.constant 0.000000e+00 : f32
    %14 = vector.broadcast %cst : f32 to vector<8x128xf32>
    %15 = arith.maximumf %13, %14 : vector<8x128xf32>
    %c1_5 = arith.constant 1 : index
    %16 = memref.load %arg1[%c1_5] : memref<32xf32, #tpu.memory_space<smem>>
    %17 = vector.broadcast %16 : f32 to vector<8x128xf32>
    %18 = arith.mulf %1, %17 : vector<8x128xf32>
    %c4 = arith.constant 4 : index
    %19 = memref.load %arg1[%c4] : memref<32xf32, #tpu.memory_space<smem>>
    %20 = vector.broadcast %19 : f32 to vector<8x128xf32>
    %21 = arith.mulf %3, %20 : vector<8x128xf32>
    %22 = arith.addf %18, %21 : vector<8x128xf32>
    %c7 = arith.constant 7 : index
    %23 = memref.load %arg1[%c7] : memref<32xf32, #tpu.memory_space<smem>>
    %24 = vector.broadcast %23 : f32 to vector<8x128xf32>
    %25 = arith.addf %22, %24 : vector<8x128xf32>
    %cst_6 = arith.constant 0.000000e+00 : f32
    %26 = vector.broadcast %cst_6 : f32 to vector<8x128xf32>
    %27 = arith.maximumf %25, %26 : vector<8x128xf32>
    %c2 = arith.constant 2 : index
    %28 = memref.load %arg1[%c2] : memref<32xf32, #tpu.memory_space<smem>>
    %29 = vector.broadcast %28 : f32 to vector<8x128xf32>
    %30 = arith.mulf %1, %29 : vector<8x128xf32>
    %c5 = arith.constant 5 : index
    %31 = memref.load %arg1[%c5] : memref<32xf32, #tpu.memory_space<smem>>
    %32 = vector.broadcast %31 : f32 to vector<8x128xf32>
    %33 = arith.mulf %3, %32 : vector<8x128xf32>
    %34 = arith.addf %30, %33 : vector<8x128xf32>
    %c8 = arith.constant 8 : index
    %35 = memref.load %arg1[%c8] : memref<32xf32, #tpu.memory_space<smem>>
    %36 = vector.broadcast %35 : f32 to vector<8x128xf32>
    %37 = arith.addf %34, %36 : vector<8x128xf32>
    %cst_7 = arith.constant 0.000000e+00 : f32
    %38 = vector.broadcast %cst_7 : f32 to vector<8x128xf32>
    %39 = arith.maximumf %37, %38 : vector<8x128xf32>
    %c9 = arith.constant 9 : index
    %40 = memref.load %arg1[%c9] : memref<32xf32, #tpu.memory_space<smem>>
    %41 = vector.broadcast %40 : f32 to vector<8x128xf32>
    %42 = arith.mulf %15, %41 : vector<8x128xf32>
    %c12 = arith.constant 12 : index
    %43 = memref.load %arg1[%c12] : memref<32xf32, #tpu.memory_space<smem>>
    %44 = vector.broadcast %43 : f32 to vector<8x128xf32>
    %45 = arith.mulf %27, %44 : vector<8x128xf32>
    %46 = arith.addf %42, %45 : vector<8x128xf32>
    %c15 = arith.constant 15 : index
    %47 = memref.load %arg1[%c15] : memref<32xf32, #tpu.memory_space<smem>>
    %48 = vector.broadcast %47 : f32 to vector<8x128xf32>
    %49 = arith.mulf %39, %48 : vector<8x128xf32>
    %50 = arith.addf %46, %49 : vector<8x128xf32>
    %c18 = arith.constant 18 : index
    %51 = memref.load %arg1[%c18] : memref<32xf32, #tpu.memory_space<smem>>
    %52 = vector.broadcast %51 : f32 to vector<8x128xf32>
    %53 = arith.addf %50, %52 : vector<8x128xf32>
    %cst_8 = arith.constant 0.000000e+00 : f32
    %54 = vector.broadcast %cst_8 : f32 to vector<8x128xf32>
    %55 = arith.maximumf %53, %54 : vector<8x128xf32>
    %c10 = arith.constant 10 : index
    %56 = memref.load %arg1[%c10] : memref<32xf32, #tpu.memory_space<smem>>
    %57 = vector.broadcast %56 : f32 to vector<8x128xf32>
    %58 = arith.mulf %15, %57 : vector<8x128xf32>
    %c13 = arith.constant 13 : index
    %59 = memref.load %arg1[%c13] : memref<32xf32, #tpu.memory_space<smem>>
    %60 = vector.broadcast %59 : f32 to vector<8x128xf32>
    %61 = arith.mulf %27, %60 : vector<8x128xf32>
    %62 = arith.addf %58, %61 : vector<8x128xf32>
    %c16 = arith.constant 16 : index
    %63 = memref.load %arg1[%c16] : memref<32xf32, #tpu.memory_space<smem>>
    %64 = vector.broadcast %63 : f32 to vector<8x128xf32>
    %65 = arith.mulf %39, %64 : vector<8x128xf32>
    %66 = arith.addf %62, %65 : vector<8x128xf32>
    %c19 = arith.constant 19 : index
    %67 = memref.load %arg1[%c19] : memref<32xf32, #tpu.memory_space<smem>>
    %68 = vector.broadcast %67 : f32 to vector<8x128xf32>
    %69 = arith.addf %66, %68 : vector<8x128xf32>
    %cst_9 = arith.constant 0.000000e+00 : f32
    %70 = vector.broadcast %cst_9 : f32 to vector<8x128xf32>
    %71 = arith.maximumf %69, %70 : vector<8x128xf32>
    %c11 = arith.constant 11 : index
    %72 = memref.load %arg1[%c11] : memref<32xf32, #tpu.memory_space<smem>>
    %73 = vector.broadcast %72 : f32 to vector<8x128xf32>
    %74 = arith.mulf %15, %73 : vector<8x128xf32>
    %c14 = arith.constant 14 : index
    %75 = memref.load %arg1[%c14] : memref<32xf32, #tpu.memory_space<smem>>
    %76 = vector.broadcast %75 : f32 to vector<8x128xf32>
    %77 = arith.mulf %27, %76 : vector<8x128xf32>
    %78 = arith.addf %74, %77 : vector<8x128xf32>
    %c17 = arith.constant 17 : index
    %79 = memref.load %arg1[%c17] : memref<32xf32, #tpu.memory_space<smem>>
    %80 = vector.broadcast %79 : f32 to vector<8x128xf32>
    %81 = arith.mulf %39, %80 : vector<8x128xf32>
    %82 = arith.addf %78, %81 : vector<8x128xf32>
    %c20 = arith.constant 20 : index
    %83 = memref.load %arg1[%c20] : memref<32xf32, #tpu.memory_space<smem>>
    %84 = vector.broadcast %83 : f32 to vector<8x128xf32>
    %85 = arith.addf %82, %84 : vector<8x128xf32>
    %cst_10 = arith.constant 0.000000e+00 : f32
    %86 = vector.broadcast %cst_10 : f32 to vector<8x128xf32>
    %87 = arith.maximumf %85, %86 : vector<8x128xf32>
    %c21 = arith.constant 21 : index
    %88 = memref.load %arg1[%c21] : memref<32xf32, #tpu.memory_space<smem>>
    %89 = vector.broadcast %88 : f32 to vector<8x128xf32>
    %90 = arith.mulf %55, %89 : vector<8x128xf32>
    %c23 = arith.constant 23 : index
    %91 = memref.load %arg1[%c23] : memref<32xf32, #tpu.memory_space<smem>>
    %92 = vector.broadcast %91 : f32 to vector<8x128xf32>
    %93 = arith.mulf %71, %92 : vector<8x128xf32>
    %94 = arith.addf %90, %93 : vector<8x128xf32>
    %c25 = arith.constant 25 : index
    %95 = memref.load %arg1[%c25] : memref<32xf32, #tpu.memory_space<smem>>
    %96 = vector.broadcast %95 : f32 to vector<8x128xf32>
    %97 = arith.mulf %87, %96 : vector<8x128xf32>
    %98 = arith.addf %94, %97 : vector<8x128xf32>
    %c27 = arith.constant 27 : index
    %99 = memref.load %arg1[%c27] : memref<32xf32, #tpu.memory_space<smem>>
    %100 = vector.broadcast %99 : f32 to vector<8x128xf32>
    %101 = arith.addf %98, %100 : vector<8x128xf32>
    %c0_11 = arith.constant 0 : index
    %c0_12 = arith.constant 0 : index
    %c0_13 = arith.constant 0 : index
    %102 = vector.load %arg3[%c0_11, %c0_12, %c0_13] : memref<2x8x128xf32, #tpu.memory_space<vmem>>, vector<1x8x128xf32>
    %103 = vector.shape_cast %102 : vector<1x8x128xf32> to vector<8x128xf32>
    %104 = vector.shape_cast %101 : vector<8x128xf32> to vector<1x8x128xf32>
    tpu.vector_store %arg3[%c0_11, %c0_12, %c0_13], %104 {strides = array<i32>} : memref<2x8x128xf32, #tpu.memory_space<vmem>>, vector<1x8x128xf32>,
    %c22 = arith.constant 22 : index
    %105 = memref.load %arg1[%c22] : memref<32xf32, #tpu.memory_space<smem>>
    %106 = vector.broadcast %105 : f32 to vector<8x128xf32>
    %107 = arith.mulf %55, %106 : vector<8x128xf32>
    %c24 = arith.constant 24 : index
    %108 = memref.load %arg1[%c24] : memref<32xf32, #tpu.memory_space<smem>>
    %109 = vector.broadcast %108 : f32 to vector<8x128xf32>
    %110 = arith.mulf %71, %109 : vector<8x128xf32>
    %111 = arith.addf %107, %110 : vector<8x128xf32>
    %c26 = arith.constant 26 : index
    %112 = memref.load %arg1[%c26] : memref<32xf32, #tpu.memory_space<smem>>
    %113 = vector.broadcast %112 : f32 to vector<8x128xf32>
    %114 = arith.mulf %87, %113 : vector<8x128xf32>
    %115 = arith.addf %111, %114 : vector<8x128xf32>
    %c28 = arith.constant 28 : index
    %116 = memref.load %arg1[%c28] : memref<32xf32, #tpu.memory_space<smem>>
    %117 = vector.broadcast %116 : f32 to vector<8x128xf32>
    %118 = arith.addf %115, %117 : vector<8x128xf32>
    %c1_14 = arith.constant 1 : index
    %c0_15 = arith.constant 0 : index
    %c0_16 = arith.constant 0 : index
    %119 = vector.load %arg3[%c1_14, %c0_15, %c0_16] : memref<2x8x128xf32, #tpu.memory_space<vmem>>, vector<1x8x128xf32>
    %120 = vector.shape_cast %119 : vector<1x8x128xf32> to vector<8x128xf32>
    %121 = vector.shape_cast %118 : vector<8x128xf32> to vector<1x8x128xf32>
    tpu.vector_store %arg3[%c1_14, %c0_15, %c0_16], %121 {strides = array<i32>} : memref<2x8x128xf32, #tpu.memory_space<vmem>>, vector<1x8x128xf32>,
    return
  }
  func.func @transform_0(%arg0: i32) -> i32 {
    %c0_i32 = arith.constant 0 : i32
    %c0_i32_0 = arith.constant 0 : i32
    return %c0_i32 : i32
  }
  func.func @transform_1(%arg0: i32) -> (i32, i32, i32) {
    %c0_i32 = arith.constant 0 : i32
    %c0_i32_0 = arith.constant 0 : i32
    %c0_i32_1 = arith.constant 0 : i32
    return %c0_i32, %arg0, %c0_i32_0 : i32, i32, i32
  }
  func.func @transform_2(%arg0: i32) -> (i32, i32, i32) {
    %c0_i32 = arith.constant 0 : i32
    %c0_i32_0 = arith.constant 0 : i32
    %c0_i32_1 = arith.constant 0 : i32
    return %c0_i32, %arg0, %c0_i32_0 : i32, i32, i32
  }
}

</mosaic_0001>

<bundles_post_ra>
// kernel: tpu_custom_call.1
= control target key start
LH: loop header
LB: loop body
LE: loop exit
PB: predicated region body
PF: predicated region fallthrough
CT: control target
= control target key end

     0   :  { %7 = vsyncpa [#allocation5], 0  ;;  %s385_s0 = inlined_call_operand.hbm [shape: f32[32], index: 0, kind: input, shape index: {}]   ;;  %s386_s1 = inlined_call_operand.hbm [shape: f32[2,8,128], index: 1, kind: input, shape index: {}]   ;;  %s387_s2 = inlined_call_operand.hbm [shape: f32[2,8,128], index: 2, kind: output, shape index: {}]  }
   0x1   :  { %8 = vsyncpa [#allocation3], 0 }
   0x2   :  { %9 = vsyncpa [#allocation4], 0  ;;  %s200_s11 = scalar_lea.hbm %s385_s0, 16 }
   0x3   :  { %p201_p0 = scmp.ne.s32.totalorder %s385_s0, %s200_s11  ;;  %p204_p1 = scmp.lt.u32.totalorder %s200_s11, %s385_s0 }
   0x5   :  { %p206_p2 = pnand %p204_p1, %p201_p0 }
   0x7   :  { %209 = shalt.err (!%p206_p2)
}
   0x8   :  { %s260_s16 = smov [#allocation2]   ;;  %s261_s19 = smov [#allocation6]  }
   0x9   :  { %17 = dma.hbm_to_smem %s385_s0, 16, %s260_s16, [#allocation5]  }
   0xa   :  { %s23_s20 = sshll.u32 %s261_s19, 4  ;;  %s210_s23 = scalar_lea.hbm %s386_s1, 256  ;;  %s24_s20 = int_to_ptr.vmem [resolvable:$true] %s23_s20 }
   0xb   :  { %p211_p3 = scmp.ne.s32.totalorder %s386_s1, %s210_s23  ;;  %p214_p4 = scmp.lt.u32.totalorder %s210_s23, %s386_s1 }
   0xd   :  { %p216_p5 = pnand %p214_p4, %p211_p3 }
   0xf   :  { %219 = shalt.err (!%p216_p5)
}
  0x10   :  { %s220_s28 = scalar_lea.vmem %s24_s20, 256  ;;  %p225_p7 = scmp.lt.s32.totalorder %s24_s20, %s24_s20 }
  0x11   :  { %p221_p6 = scmp.ne.s32.totalorder %s24_s20, %s220_s28  ;;  %p226_p8 = scmp.lt.s32.totalorder %s220_s28, %s220_s28 }
  0x13   :  { %p227_p9 = por %p226_p8, %p225_p7 }
  0x15   :  { %p228_p10 = pnand %p227_p9, %p221_p6 }
  0x17   :  { %231 = shalt.err (!%p228_p10)
}
  0x18   :  { %s262_s0 = smov 128   ;;  %s263_s29 = smov 8  }
  0x19   :  { %29 = dma.hbm_to_vmem [thread:$0]  %s386_s1, 256, %s24_s20, [#allocation3], %s262_s0, %s262_s0, %s263_s29  }
  0x1a   :  { %254 = dma.done.wait [#allocation5], 16  }
  0x1b   :  { %255 = vsyncadd [#allocation5], 4294967280 }
  0x1c   :  { %256 = dma.done.wait [#allocation3], 256  }
  0x1d   :  { %257 = vsyncadd [#allocation3], 4294967040 }
  0x1e   :  { %36 = sfence }
  0x1f   :  { %s40_s4 = sld [smem:[#allocation2]]  ;;  %s167_s5 = sld [smem:[#allocation2 + $0x3]]  ;;  %v37_v0 = vld [vmem:[#allocation6] sm:$0xff]  ;;  %v39_v1 = vld [vmem:[#allocation6 + $0x8] sm:$0xff] }
  0x20   :  { %s307_s6 = sld [smem:[#allocation2 + $0x6]]  ;;  %s169_s7 = sld [smem:[#allocation2 + $0x1]] }
  0x21   :  { %s170_s8 = sld [smem:[#allocation2 + $0x4]]  ;;  %s309_s9 = sld [smem:[#allocation2 + $0x7]] }
  0x22   :  { %s172_s10 = sld [smem:[#allocation2 + $0x2]]  ;;  %s173_s11 = sld [smem:[#allocation2 + $0x5]] }
  0x23   :  { %s311_s12 = sld [smem:[#allocation2 + $0x8]]  ;;  %s313_s1 = sld [smem:[#allocation2 + $0x9]] }
  0x24   :  { %s315_s13 = sld [smem:[#allocation2 + $0xc]]  ;;  %s317_s14 = sld [smem:[#allocation2 + $0xf]] }
  0x25   :  { %v41_v2 = vstv %s40_s4  ;;  %v44_v3 = vstv %s167_s5  ;;  %s319_s15 = sld [smem:[#allocation2 + $0xa]]  ;;  %s321_s16 = sld [smem:[#allocation2 + $0xd]] }
  0x26   :  { %v42_v4 = vmul.f32 %v41_v2, %v37_v0  ;;  %v45_v5 = vmul.f32 %v44_v3, %v39_v1  ;;  %v52_v6 = vstv %s169_s7  ;;  %s323_s17 = sld [smem:[#allocation2 + $0x10]]  ;;  %v48_v7 = vstv %s307_s6  ;;  %s326_s18 = sld [smem:[#allocation2 + $0xb]] }
  0x27   :  { %v53_v8 = vmul.f32 %v52_v6, %v37_v0  ;;  %v55_v9 = vstv %s170_s8  ;;  %s328_s19 = sld [smem:[#allocation2 + $0xe]]  ;;  %s330_s20 = sld [smem:[#allocation2 + $0x11]]  ;;  %v59_v14 = vstv %s309_s9 }
  0x28   :  { %v46_v10 = vadd.f32 %v45_v5, %v42_v4  ;;  %v56_v11 = vmul.f32 %v55_v9, %v39_v1  ;;  %v63_v12 = vstv %s172_s10  ;;  %v66_v13 = vstv %s173_s11  ;;  %s334_s21 = sld [smem:[#allocation2 + $0x12]]  ;;  %s338_s22 = sld [smem:[#allocation2 + $0x13]] }
  0x29   :  { %v64_v15 = vmul.f32 %v63_v12, %v37_v0  ;;  %v67_v16 = vmul.f32 %v66_v13, %v39_v1  ;;  %v70_v19 = vstv %s311_s12  ;;  %v74_v21 = vstv %s313_s1  ;;  %s340_s23 = sld [smem:[#allocation2 + $0x14]]  ;;  %s347_s24 = sld [smem:[#allocation2 + $0x15]] }
  0x2a   :  { %v49_v17 = vadd.f32 %v48_v7, %v46_v10  ;;  %v57_v18 = vadd.f32 %v56_v11, %v53_v8  ;;  %v77_v25 = vstv %s315_s13  ;;  %v81_v26 = vstv %s317_s14  ;;  %s349_s25 = sld [smem:[#allocation2 + $0x17]]  ;;  %s351_s26 = sld [smem:[#allocation2 + $0x19]] }
  0x2b   :  { %v68_v20 = vadd.f32 %v67_v16, %v64_v15  ;;  %v89_v22 = vstv %s319_s15  ;;  %v92_v28 = vstv %s321_s16  ;;  %s355_s27 = sld [smem:[#allocation2 + $0x16]]  ;;  %s357_s28 = sld [smem:[#allocation2 + $0x18]] }
  0x2c   :  { %v50_v23 = vmax.f32 %v49_v17, 0.0  ;;  %v60_v24 = vadd.f32 %v59_v14, %v57_v18  ;;  %v96_v29 = vstv %s323_s17  ;;  %v104_v30 = vstv %s326_s18  ;;  %s359_s30 = sld [smem:[#allocation2 + $0x1a]]  ;;  %s190_s3 = sld [smem:[#allocation2 + $0x1b]] }
  0x2d   :  { %v71_v27 = vadd.f32 %v70_v19, %v68_v20  ;;  %v107_v36 = vstv %s328_s19  ;;  %v111_v37 = vstv %s330_s20  ;;  %s194_s4 = sld [smem:[#allocation2 + $0x1c]]  ;;  %s264_s5 = smov [#allocation7]  }
  0x2e   :  { %v61_v31 = vmax.f32 %v60_v24, 0.0  ;;  %v75_v32 = vmul.f32 %v74_v21, %v50_v23  ;;  %v90_v33 = vmul.f32 %v89_v22, %v50_v23  ;;  %v105_v34 = vmul.f32 %v104_v30, %v50_v23  ;;  %s154_s6 = sshll.u32 %s264_s5, 4  ;;  %s155_s6 = int_to_ptr.vmem [resolvable:$true] %s154_s6 }
  0x2f   :  { %v72_v35 = vmax.f32 %v71_v27, 0.0  ;;  %v85_v47 = vstv %s334_s21  ;;  %v100_v48 = vstv %s338_s22  ;;  %v115_v49 = vstv %s340_s23  ;;  %s232_s7 = scalar_lea.vmem %s155_s6, 256  ;;  %p237_p12 = scmp.lt.s32.totalorder %s155_s6, %s155_s6 }
  0x30   :  { %v78_v38 = vmul.f32 %v77_v25, %v61_v31  ;;  %v93_v39 = vmul.f32 %v92_v28, %v61_v31  ;;  %v108_v40 = vmul.f32 %v107_v36, %v61_v31  ;;  %v119_v56 = vstv %s347_s24  ;;  %p233_p11 = scmp.ne.s32.totalorder %s155_s6, %s232_s7  ;;  %p238_p13 = scmp.lt.s32.totalorder %s232_s7, %s232_s7 }
  0x31   :  { %v82_v41 = vmul.f32 %v81_v26, %v72_v35  ;;  %v97_v42 = vmul.f32 %v96_v29, %v72_v35  ;;  %v112_v43 = vmul.f32 %v111_v37, %v72_v35  ;;  %v122_v57 = vstv %s349_s25 }
  0x32   :  { %v79_v44 = vadd.f32 %v78_v38, %v75_v32  ;;  %v94_v45 = vadd.f32 %v93_v39, %v90_v33  ;;  %v109_v46 = vadd.f32 %v108_v40, %v105_v34  ;;  %v126_v58 = vstv %s351_s26  ;;  %p239_p0 = por %p238_p13, %p237_p12 }
  0x33   :  { %v134_v59 = vstv %s355_s27  ;;  %v137_v60 = vstv %s357_s28  ;;  %v141_v0 = vstv %s359_s30  ;;  %v130_v8 = vstv %s190_s3 }
  0x34   :  { %v83_v50 = vadd.f32 %v82_v41, %v79_v44  ;;  %v98_v51 = vadd.f32 %v97_v42, %v94_v45  ;;  %v113_v52 = vadd.f32 %v112_v43, %v109_v46  ;;  %v145_v11 = vstv %s194_s4  ;;  %p240_p1 = pnand %p239_p0, %p233_p11 }
  0x36   :  { %v86_v53 = vadd.f32 %v85_v47, %v83_v50  ;;  %v101_v54 = vadd.f32 %v100_v48, %v98_v51  ;;  %v116_v55 = vadd.f32 %v115_v49, %v113_v52 }
  0x38   :  { %v87_v61 = vmax.f32 %v86_v53, 0.0  ;;  %v102_v62 = vmax.f32 %v101_v54, 0.0  ;;  %v117_v63 = vmax.f32 %v116_v55, 0.0 }
  0x3a   :  { %v120_v1 = vmul.f32 %v119_v56, %v87_v61  ;;  %v123_v2 = vmul.f32 %v122_v57, %v102_v62  ;;  %v127_v3 = vmul.f32 %v126_v58, %v117_v63  ;;  %v135_v4 = vmul.f32 %v134_v59, %v87_v61 }
  0x3b   :  { %v138_v5 = vmul.f32 %v137_v60, %v102_v62  ;;  %v142_v6 = vmul.f32 %v141_v0, %v117_v63 }
  0x3c   :  { %v124_v7 = vadd.f32 %v123_v2, %v120_v1 }
  0x3d   :  { %v139_v9 = vadd.f32 %v138_v5, %v135_v4 }
  0x3e   :  { %v128_v10 = vadd.f32 %v127_v3, %v124_v7 }
  0x3f   :  { %v143_v12 = vadd.f32 %v142_v6, %v139_v9 }
  0x40   :  { %v131_v13 = vadd.f32 %v130_v8, %v128_v10 }
  0x41   :  { %v146_v14 = vadd.f32 %v145_v11, %v143_v12 }
  0x42   :  { %132 = vst [vmem:[#allocation7] sm:$0xff] %v131_v13 }
  0x43   :  { %148 = vst [vmem:[#allocation7 + $0x8] sm:$0xff] %v146_v14 }
  0x44   :  { %243 = shalt.err (!%p240_p1)
}
  0x45   :  { %s244_s10 = scalar_lea.hbm %s387_s2, 256 }
  0x46   :  { %p245_p2 = scmp.ne.s32.totalorder %s387_s2, %s244_s10  ;;  %p248_p3 = scmp.lt.u32.totalorder %s244_s10, %s387_s2 }
  0x48   :  { %p250_p4 = pnand %p248_p3, %p245_p2 }
  0x4a   :  { %253 = shalt.err (!%p250_p4)
}
  0x4b   :  { %160 = dma.vmem_to_hbm [thread:$0]  %s155_s6, 256, %s387_s2, [#allocation4], %s262_s0, %s262_s0, %s263_s29  }
  0x4c   :  { %258 = dma.done.wait [#allocation4], 256  }
  0x4d   :  { %259 = vsyncadd [#allocation4], 4294967040 }
  0x4e   :  { %164 = vsyncpa [#allocation3], 1 }
  0x4f   :  { %165 = vsyncpa [#allocation4], 1 }
  0x50   :  { %166 = vsyncpa [#allocation5], 1 }

</bundles_post_ra>
